<compile_context>
chip_gen: v7x
topology: tpu7x:2x2x1
jax: 0.10.0
libtpu: 0.0.40
codegen_flags: <defaults>
</compile_context>

<pallas_src>
import functools

import jax
import jax.numpy as jnp
from jax.experimental import pallas as pl
from jax.experimental.pallas import tpu as pltpu


def _round_up(x, m):
    return (x + m - 1) // m * m


def mlp_kernel(x_ref, w_ref, b_ref, o_ref, *, F, H1, H2, H3, o1, o2, o3, o4):
    # x arrives as f32 (no separate wrapper cast pass); downcast in-register for
    # the MXU.  w_ref: packed bf16 weights; b_ref: packed f32 biases.
    x = x_ref[...].astype(jnp.bfloat16)

    def layer(h, row_off, k, n, bias_row):
        w = w_ref[row_off:row_off + k, 0:n]                          # bf16 (k, n)
        y = jnp.dot(h, w, preferred_element_type=jnp.float32)        # f32 acc
        y = y + b_ref[bias_row:bias_row + 1, 0:n]                    # f32 bias
        # bias-add f32 -> downcast -> ReLU in bf16 (max(.,0) commutes with the
        # rounding downcast, so numerics are identical; half the VPU work on
        # v6e/v7x and half the live bytes feeding the next matmul).
        return jnp.maximum(y.astype(jnp.bfloat16), 0.0)

    h1 = layer(x,  o1, F,  H1, 0)
    h2 = layer(h1, o2, H1, H2, 1)
    h3 = layer(h2, o3, H2, H3, 2)

    # Layer 4 (H3 -> 1): VPU multiply + XLU lane reduction instead of a padded
    # N=1 MXU matmul.  Accumulate in f32.
    w4 = w_ref[o4:o4 + 1, 0:H3].astype(jnp.float32)                  # (1, H3)
    z = jnp.sum(h3.astype(jnp.float32) * w4, axis=-1, keepdims=True)  # (TB, 1)
    z = z + b_ref[3:4, 0:1]

    # Sigmoid: exp and the approximate reciprocal both run on the EUP slot.
    o_ref[...] = pl.reciprocal(1.0 + jnp.exp(-z), approx=True).astype(o_ref.dtype)


def _pack_params(params):
    """Pack 4 (W, b) pairs into one bf16 weight slab and one f32 bias slab."""
    (w1, b1), (w2, b2), (w3, b3), (w4, b4) = params
    F, H1 = w1.shape
    H2 = w2.shape[1]
    H3 = w3.shape[1]
    LW = max(128, H1, H2, H3)                  # lane width of the packed slabs

    o1 = 0
    o2 = _round_up(o1 + F, 8)
    o3 = _round_up(o2 + H1, 8)
    o4 = _round_up(o3 + H2, 8)
    n_rows = _round_up(o4 + 1, 8)

    bf = jnp.bfloat16
    wpack = jnp.zeros((n_rows, LW), bf)
    wpack = wpack.at[o1:o1 + F, 0:H1].set(w1.astype(bf))
    wpack = wpack.at[o2:o2 + H1, 0:H2].set(w2.astype(bf))
    wpack = wpack.at[o3:o3 + H2, 0:H3].set(w3.astype(bf))
    wpack = wpack.at[o4, 0:H3].set(w4[:, 0].astype(bf))      # W4^T as one row

    bpack = jnp.zeros((8, LW), jnp.float32)
    bpack = bpack.at[0, 0:H1].set(b1.reshape(-1).astype(jnp.float32))
    bpack = bpack.at[1, 0:H2].set(b2.reshape(-1).astype(jnp.float32))
    bpack = bpack.at[2, 0:H3].set(b3.reshape(-1).astype(jnp.float32))
    bpack = bpack.at[3, 0].set(b4.reshape(-1)[0].astype(jnp.float32))

    dims = dict(F=F, H1=H1, H2=H2, H3=H3, o1=o1, o2=o2, o3=o3, o4=o4)
    return wpack, bpack, dims


def _choose_tile(B, block_batch, max_rows_vmem):
    """Pick the batch tile TB and padded batch Bp.

    * B <= 128: one block equal to the (8-aligned) array -> always a valid spec.
    * Larger B: TB is a multiple of 128, capped by block_batch and the VMEM
      budget, and chosen so the grid has >= 2 steps (v7x megacore sharding).
    """
    Ba = _round_up(B, 8)
    if Ba <= 128:
        return Ba, Ba
    tb = min(block_batch, max_rows_vmem, Ba)
    tb = max(128, (tb // 128) * 128)
    if 2 * tb > Ba:                       # would collapse to a single grid step
        tb = max(128, _round_up((Ba + 1) // 2, 128))
    return tb, _round_up(Ba, tb)


def mlp_classifier(x, params, block_batch=2048):
    """Forward pass of MLPClassifier. x: (B, F) f32 -> (B, 1) f32."""
    B, F = x.shape
    wpack, bpack, dims = _pack_params(params)
    assert dims["F"] == F
    H1, H2, H3 = dims["H1"], dims["H2"], dims["H3"]

    # VMEM budget for the batch tile: double-buffered f32 x tile, f32-sized
    # headroom for the live activations, double-buffered output column, plus the
    # resident (single-copy-at-steady-state, but conservatively 2x) slabs.
    # Keep it ~20 MiB so the 32 MiB scoped-VMEM request below always has slack.
    slab_bytes = 2 * (wpack.size * wpack.dtype.itemsize + bpack.size * 4)
    per_row = 2 * F * 4 + 4 * (H1 + H2 + H3) + 8 + 64
    budget = 20 * 1024 * 1024
    max_rows_vmem = max(128, (budget - slab_bytes) // per_row)

    TB, Bp = _choose_tile(B, block_batch, max_rows_vmem)

    # No wrapper-side bf16 cast (done in-kernel); pad in f32 only when needed.
    xi = x.astype(jnp.float32)
    if Bp != B:
        xi = jnp.pad(xi, ((0, Bp - B), (0, 0)))

    kernel = functools.partial(mlp_kernel, **dims)
    out = pl.pallas_call(
        kernel,
        out_shape=jax.ShapeDtypeStruct((Bp, 1), jnp.float32),
        grid=(Bp // TB,),
        in_specs=[
            pl.BlockSpec((TB, F), lambda i: (i, 0)),          # x tile (pipelined)
            pl.BlockSpec(wpack.shape, lambda i: (0, 0)),      # weights, resident
            pl.BlockSpec(bpack.shape, lambda i: (0, 0)),      # biases, resident
        ],
        out_specs=pl.BlockSpec((TB, 1), lambda i: (i, 0)),
        compiler_params=pltpu.CompilerParams(
            dimension_semantics=("parallel",),                # batch across TCs (v7x)
            vmem_limit_bytes=32 * 1024 * 1024,                # > v5e's 16 MiB default,
        ),                                                    # within v7x 64 MiB phys.
    )(xi, wpack, bpack)
    # Padded rows (if any) contain garbage sigmoid(bias) values; slice them off.
    return out[:B]


def init_params(key, input_size, hidden1=128, hidden2=64, hidden3=32):
    """Deterministic init mirroring nn.Linear shapes (stored as [in, out])."""
    dims = [(input_size, hidden1), (hidden1, hidden2),
            (hidden2, hidden3), (hidden3, 1)]
    params = []
    for fan_in, fan_out in dims:
        key, kw, kb = jax.random.split(key, 3)
        bound = 1.0 / jnp.sqrt(fan_in)
        w = jax.random.uniform(kw, (fan_in, fan_out), jnp.float32, -bound, bound)
        b = jax.random.uniform(kb, (1, fan_out), jnp.float32, -bound, bound)
        params.append((w, b))
    return params


def mlp_reference_bf16(x, params):
    """Reference matching the kernel's bf16-matmul / f32-accumulate numerics."""
    (w1, b1), (w2, b2), (w3, b3), (w4, b4) = params
    bf = jnp.bfloat16
    h = x.astype(bf)
    for w, b in [(w1, b1), (w2, b2), (w3, b3)]:
        h = jnp.dot(h, w.astype(bf), preferred_element_type=jnp.float32) + b
        h = jnp.maximum(h, 0.0).astype(bf)
    w4f = w4.astype(bf).astype(jnp.float32)
    z = jnp.sum(h.astype(jnp.float32) * w4f[:, 0][None, :],
                axis=-1, keepdims=True) + b4
    return jax.nn.sigmoid(z)


def mlp_reference_f32(x, params):
    h = x
    for i, (w, b) in enumerate(params):
        h = h @ w + b
        if i < len(params) - 1:
            h = jnp.maximum(h, 0.0)
    return jax.nn.sigmoid(h)


if __name__ == "__main__":
    key = jax.random.PRNGKey(0)
    k_x, k_p = jax.random.split(key)

    batch, input_size = 8, 32
    x = jax.random.normal(k_x, (batch, input_size), jnp.float32)
    params = init_params(k_p, input_size)

    out = jax.block_until_ready(mlp_classifier(x, params))

    ref_bf16 = mlp_reference_bf16(x, params)
    ref_f32 = mlp_reference_f32(x, params)

    assert out.shape == (batch, 1)
    assert jnp.allclose(out, ref_bf16, atol=1e-2, rtol=1e-2)
    assert jnp.allclose(out, ref_f32, atol=5e-2, rtol=5e-2)

    print("KERNEL_OK")
</pallas_src>

<mosaic_0001>
module attributes {stable_mosaic.version = 11 : i64} {
  func.func @mlp_kernel(%arg0: i32, %arg1: memref<8x32xf32, #tpu.memory_space<vmem>>, %arg2: memref<232x128xbf16, #tpu.memory_space<vmem>>, %arg3: memref<8x128xf32, #tpu.memory_space<vmem>>, %arg4: memref<8x1xf32, #tpu.memory_space<vmem>>) attributes {dimension_semantics = [#tpu.dimension_semantics<parallel>], iteration_bounds = array<i64: 1>, scalar_prefetch = 0 : i64, scratch_operands = 0 : i64, tpu.core_type = #tpu.core_type<tc>, window_params = [{transform_indices = @transform_0, window_bounds = array<i64: 8, 32>}, {pipeline_mode = #tpu.pipeline_mode<synchronous>, transform_indices = @transform_1, window_bounds = array<i64: 232, 128>}, {pipeline_mode = #tpu.pipeline_mode<synchronous>, transform_indices = @transform_2, window_bounds = array<i64: 8, 128>}, {transform_indices = @transform_3, window_bounds = array<i64: 8, 1>}]} {
    %c0 = arith.constant 0 : index
    %c0_0 = arith.constant 0 : index
    %0 = vector.load %arg1[%c0, %c0_0] : memref<8x32xf32, #tpu.memory_space<vmem>>, vector<8x32xf32>
    %1 = arith.truncf %0 : vector<8x32xf32> to vector<8x32xbf16>
    %c0_1 = arith.constant 0 : index
    %c0_2 = arith.constant 0 : index
    %2 = vector.load %arg2[%c0_1, %c0_2] : memref<232x128xbf16, #tpu.memory_space<vmem>>, vector<32x128xbf16>
    %cst = arith.constant dense<0.000000e+00> : vector<8x128xf32>
    %3 = tpu.matmul %1, %2, %cst {dimension_numbers = #tpu.dot_dimension_numbers<[1], [0], [0], [1], [0, 0, 1, 1], [], []>} : vector<8x32xbf16>, vector<32x128xbf16>, vector<8x128xf32> -> vector<8x128xf32>
    %c0_3 = arith.constant 0 : index
    %c0_4 = arith.constant 0 : index
    %4 = vector.load %arg3[%c0_3, %c0_4] : memref<8x128xf32, #tpu.memory_space<vmem>>, vector<1x128xf32>
    %5 = vector.broadcast %4 : vector<1x128xf32> to vector<8x128xf32>
    %6 = arith.addf %3, %5 : vector<8x128xf32>
    %7 = arith.truncf %6 : vector<8x128xf32> to vector<8x128xbf16>
    %cst_5 = arith.constant 0.000000e+00 : bf16
    %8 = vector.broadcast %cst_5 : bf16 to vector<8x128xbf16>
    %9 = arith.maximumf %7, %8 : vector<8x128xbf16>
    %c32 = arith.constant 32 : index
    %c0_6 = arith.constant 0 : index
    %10 = vector.load %arg2[%c32, %c0_6] : memref<232x128xbf16, #tpu.memory_space<vmem>>, vector<128x64xbf16>
    %cst_7 = arith.constant dense<0.000000e+00> : vector<8x64xf32>
    %11 = tpu.matmul %9, %10, %cst_7 {dimension_numbers = #tpu.dot_dimension_numbers<[1], [0], [0], [1], [0, 0, 1, 1], [], []>} : vector<8x128xbf16>, vector<128x64xbf16>, vector<8x64xf32> -> vector<8x64xf32>
    %c1 = arith.constant 1 : index
    %c0_8 = arith.constant 0 : index
    %12 = vector.load %arg3[%c1, %c0_8] : memref<8x128xf32, #tpu.memory_space<vmem>>, vector<1x64xf32>
    %13 = vector.broadcast %12 : vector<1x64xf32> to vector<8x64xf32>
    %14 = arith.addf %11, %13 : vector<8x64xf32>
    %15 = arith.truncf %14 : vector<8x64xf32> to vector<8x64xbf16>
    %cst_9 = arith.constant 0.000000e+00 : bf16
    %16 = vector.broadcast %cst_9 : bf16 to vector<8x64xbf16>
    %17 = arith.maximumf %15, %16 : vector<8x64xbf16>
    %c160 = arith.constant 160 : index
    %c0_10 = arith.constant 0 : index
    %18 = vector.load %arg2[%c160, %c0_10] : memref<232x128xbf16, #tpu.memory_space<vmem>>, vector<64x32xbf16>
    %cst_11 = arith.constant dense<0.000000e+00> : vector<8x32xf32>
    %19 = tpu.matmul %17, %18, %cst_11 {dimension_numbers = #tpu.dot_dimension_numbers<[1], [0], [0], [1], [0, 0, 1, 1], [], []>} : vector<8x64xbf16>, vector<64x32xbf16>, vector<8x32xf32> -> vector<8x32xf32>
    %c2 = arith.constant 2 : index
    %c0_12 = arith.constant 0 : index
    %20 = vector.load %arg3[%c2, %c0_12] : memref<8x128xf32, #tpu.memory_space<vmem>>, vector<1x32xf32>
    %21 = vector.broadcast %20 : vector<1x32xf32> to vector<8x32xf32>
    %22 = arith.addf %19, %21 : vector<8x32xf32>
    %23 = arith.truncf %22 : vector<8x32xf32> to vector<8x32xbf16>
    %cst_13 = arith.constant 0.000000e+00 : bf16
    %24 = vector.broadcast %cst_13 : bf16 to vector<8x32xbf16>
    %25 = arith.maximumf %23, %24 : vector<8x32xbf16>
    %c224 = arith.constant 224 : index
    %c0_14 = arith.constant 0 : index
    %26 = vector.load %arg2[%c224, %c0_14] : memref<232x128xbf16, #tpu.memory_space<vmem>>, vector<1x32xbf16>
    %27 = arith.extf %26 : vector<1x32xbf16> to vector<1x32xf32>
    %28 = arith.extf %25 : vector<8x32xbf16> to vector<8x32xf32>
    %29 = vector.broadcast %27 : vector<1x32xf32> to vector<8x32xf32>
    %30 = arith.mulf %28, %29 : vector<8x32xf32>
    %cst_15 = arith.constant dense<0.000000e+00> : vector<8xf32>
    %31 = vector.multi_reduction <add>, %30, %cst_15 [1] : vector<8x32xf32> to vector<8xf32>
    %32 = vector.shape_cast %31 : vector<8xf32> to vector<8x1xf32>
    %c3 = arith.constant 3 : index
    %c0_16 = arith.constant 0 : index
    %33 = vector.load %arg3[%c3, %c0_16] : memref<8x128xf32, #tpu.memory_space<vmem>>, vector<1x1xf32>
    %34 = vector.broadcast %33 : vector<1x1xf32> to vector<8x1xf32>
    %35 = arith.addf %32, %34 : vector<8x1xf32>
    %cst_17 = arith.constant 0.000000e+00 : f32
    %36 = vector.broadcast %cst_17 : f32 to vector<8x1xf32>
    %37 = arith.subf %36, %35 : vector<8x1xf32>
    %38 = math.exp %37 : vector<8x1xf32>
    %cst_18 = arith.constant 1.000000e+00 : f32
    %39 = vector.broadcast %cst_18 : f32 to vector<8x1xf32>
    %40 = arith.addf %39, %38 : vector<8x1xf32>
    %41 = tpu.reciprocal %40 {approx = true} : vector<8x1xf32> -> vector<8x1xf32>
    %c0_19 = arith.constant 0 : index
    %c0_20 = arith.constant 0 : index
    %42 = vector.load %arg4[%c0_19, %c0_20] : memref<8x1xf32, #tpu.memory_space<vmem>>, vector<8x1xf32>
    tpu.vector_store %arg4[%c0_19, %c0_20], %41 {strides = array<i32>} : memref<8x1xf32, #tpu.memory_space<vmem>>, vector<8x1xf32>,
    return
  }
  func.func @transform_0(%arg0: i32) -> (i32, i32) {
    %c0_i32 = arith.constant 0 : i32
    %c0_i32_0 = arith.constant 0 : i32
    return %arg0, %c0_i32 : i32, i32
  }
  func.func @transform_1(%arg0: i32) -> (i32, i32) {
    %c0_i32 = arith.constant 0 : i32
    %c0_i32_0 = arith.constant 0 : i32
    %c0_i32_1 = arith.constant 0 : i32
    return %c0_i32, %c0_i32_0 : i32, i32
  }
  func.func @transform_2(%arg0: i32) -> (i32, i32) {
    %c0_i32 = arith.constant 0 : i32
    %c0_i32_0 = arith.constant 0 : i32
    %c0_i32_1 = arith.constant 0 : i32
    return %c0_i32, %c0_i32_0 : i32, i32
  }
  func.func @transform_3(%arg0: i32) -> (i32, i32) {
    %c0_i32 = arith.constant 0 : i32
    %c0_i32_0 = arith.constant 0 : i32
    return %arg0, %c0_i32 : i32, i32
  }
}

</mosaic_0001>

<bundles_post_ra>
// kernel: tpu_custom_call.1
= control target key start
LH: loop header
LB: loop body
LE: loop exit
PB: predicated region body
PF: predicated region fallthrough
CT: control target
= control target key end

     0   :  { %8 = vsyncpa [#allocation3], 0  ;;  %s590_s0 = inlined_call_operand.hbm [shape: f32[8,32], index: 0, kind: input, shape index: {}]   ;;  %s591_s1 = inlined_call_operand.hbm [shape: bf16[232,128], index: 1, kind: input, shape index: {}]   ;;  %s592_s2 = inlined_call_operand.hbm [shape: f32[8,128], index: 2, kind: input, shape index: {}]   ;;  %s593_s3 = inlined_call_operand.vmem [shape: f32[8,1], index: 3, kind: output, shape index: {}]  }
   0x1   :  { %9 = vsyncpa [#allocation5], 0  ;;  %s518_s12 = smov [#allocation4]   ;;  %s448_s16 = scalar_lea.hbm %s591_s1, 1856 }
   0x2   :  { %s25_s13 = sshll.u32 %s518_s12, 4  ;;  %p449_p0 = scmp.ne.s32.totalorder %s591_s1, %s448_s16  ;;  %s26_s13 = int_to_ptr.vmem [resolvable:$true] %s25_s13 }
   0x3   :  { %p452_p1 = scmp.lt.u32.totalorder %s448_s16, %s591_s1 }
   0x5   :  { %p454_p2 = pnand %p452_p1, %p449_p0 }
   0x7   :  { %457 = shalt.err (!%p454_p2)
}
   0x8   :  { %s458_s21 = scalar_lea.vmem %s26_s13, 1856  ;;  %p463_p4 = scmp.lt.s32.totalorder %s26_s13, %s26_s13 }
   0x9   :  { %p459_p3 = scmp.ne.s32.totalorder %s26_s13, %s458_s21  ;;  %p464_p5 = scmp.lt.s32.totalorder %s458_s21, %s458_s21 }
   0xb   :  { %p465_p6 = por %p464_p5, %p463_p4 }
   0xd   :  { %p466_p7 = pnand %p465_p6, %p459_p3 }
   0xf   :  { %469 = shalt.err (!%p466_p7)
}
  0x10   :  { %s519_s22 = smov 64   ;;  %s520_s23 = smov 4  }
  0x11   :  { %31 = dma.hbm_to_vmem [thread:$0]  %s591_s1, 1856, %s26_s13, [#allocation5], %s519_s22, %s519_s22, %s520_s23  }
  0x12   :  { %s521_s26 = smov [#allocation2]   ;;  %s522_s28 = smov [#allocation6]  }
  0x13   :  { %s16_s27 = sshll.u32 %s521_s26, 4  ;;  %s38_s29 = sshll.u32 %s522_s28, 4  ;;  %s17_s27 = int_to_ptr.vmem [resolvable:$true] %s16_s27  ;;  %s39_s29 = int_to_ptr.vmem [resolvable:$true] %s38_s29 }
  0x14   :  { %s470_s5 = scalar_lea.hbm %s590_s0, 128 }
  0x15   :  { %p471_p8 = scmp.ne.s32.totalorder %s590_s0, %s470_s5  ;;  %p474_p9 = scmp.lt.u32.totalorder %s470_s5, %s590_s0 }
  0x17   :  { %p476_p10 = pnand %p474_p9, %p471_p8 }
  0x19   :  { %479 = shalt.err (!%p476_p10)
}
  0x1a   :  { %s480_s1 = scalar_lea.vmem %s17_s27, 128  ;;  %p485_p12 = scmp.lt.s32.totalorder %s17_s27, %s17_s27 }
  0x1b   :  { %p481_p11 = scmp.ne.s32.totalorder %s17_s27, %s480_s1  ;;  %p486_p13 = scmp.lt.s32.totalorder %s480_s1, %s480_s1 }
  0x1d   :  { %p487_p0 = por %p486_p13, %p485_p12 }
  0x1f   :  { %p488_p1 = pnand %p487_p0, %p481_p11 }
  0x21   :  { %491 = shalt.err (!%p488_p1)
}
  0x22   :  { %19 = dma.hbm_to_vmem [thread:$0]  %s590_s0, 128, %s17_s27, [#allocation3]  }
  0x23   :  { %s492_s14 = scalar_lea.hbm %s592_s2, 128 }
  0x24   :  { %p493_p2 = scmp.ne.s32.totalorder %s592_s2, %s492_s14  ;;  %p496_p3 = scmp.lt.u32.totalorder %s492_s14, %s592_s2 }
  0x26   :  { %p498_p4 = pnand %p496_p3, %p493_p2 }
  0x28   :  { %501 = shalt.err (!%p498_p4)
}
  0x29   :  { %s502_s19 = scalar_lea.vmem %s39_s29, 128  ;;  %p507_p6 = scmp.lt.s32.totalorder %s39_s29, %s39_s29 }
  0x2a   :  { %p503_p5 = scmp.ne.s32.totalorder %s39_s29, %s502_s19  ;;  %p508_p7 = scmp.lt.s32.totalorder %s502_s19, %s502_s19 }
  0x2c   :  { %p509_p8 = por %p508_p7, %p507_p6 }
  0x2e   :  { %p510_p9 = pnand %p509_p8, %p503_p5 }
  0x30   :  { %513 = shalt.err (!%p510_p9)
}
  0x31   :  { %41 = dma.hbm_to_vmem [thread:$0]  %s592_s2, 128, %s39_s29, [#allocation5]  }
  0x32   :  { %514 = dma.done.wait [#allocation3], 128  }
  0x33   :  { %515 = vsyncadd [#allocation3], 4294967168 }
  0x34   :  { %516 = dma.done.wait [#allocation5], 1984  }
  0x35   :  { %517 = vsyncadd [#allocation5], 4294965312  ;;  %v523_v0 = vmov 0.0   ;;  %vm524_vm0 = vmmov 0   ;;  %v430_v1 = vld [vmem:[#allocation4] sm:$0xff]   ;;  %v431_v2 = vld [vmem:[#allocation4 + $0x8] sm:$0xff]   ;;  %v318_v34 = vlaneseq }
  0x36   :  { %382 = vmatprep.subr.bf16.mxu0 %v523_v0  ;;  %386 = vmatprep.mubr.msk.bf16.mxu0 %vm524_vm0, %v523_v0  ;;  %v52_v3 = vld [vmem:[#allocation2] sm:$0xff]  ;;  %v432_v4 = vld [vmem:[#allocation4 + $0x10] sm:$0xff]   ;;  %vm75_vm1 = vcmask 261120   ;;  %v434_v7 = vld [vmem:[#allocation4 + $0x20] sm:$0xff]   ;;  %v525_v22 = vmov 0   ;;  %vm269_vm2 = vcmask 523264  }
  0x37   :  { %390 = vmatprep.subr.bf16.mxu1 %v523_v0  ;;  %406 = vmatprep.mubr.msk.bf16.mxu1 %vm524_vm0, %v523_v0  ;;  %v53_v5 = vpack.c.bf16 %v52_v3, %v52_v3  ;;  %v433_v6 = vld [vmem:[#allocation4 + $0x18] sm:$0xff]   ;;  %v435_v8 = vld [vmem:[#allocation4 + $0x28] sm:$0xff]   ;;  %v436_v9 = vld [vmem:[#allocation4 + $0x30] sm:$0xff]   ;;  %v319_v35 = vshrl.u32 %v318_v34, 7  ;;  %vm337_vm3 = vcmask 7168  }
  0x38   :  { %383 = vmatpush3.bf16.msra.mxu0 %v430_v1  ;;  %391 = vmatpush3.bf16.msra.mxu1 %v432_v4  ;;  %v437_v10 = vld [vmem:[#allocation4 + $0x38] sm:$0xff]   ;;  %v438_v11 = vld [vmem:[#allocation4 + $0x40] sm:$0xff]   ;;  %v439_v12 = vld [vmem:[#allocation4 + $0x48] sm:$0xff]  }
  0x39   :  { %384 = vmatprep.subr.bf16.mxu0 %v523_v0  ;;  %392 = vmatprep.subr.bf16.mxu1 %v523_v0  ;;  %v440_v13 = vld [vmem:[#allocation4 + $0x50] sm:$0xff]   ;;  %v441_v14 = vld [vmem:[#allocation4 + $0x58] sm:$0xff]   ;;  %v442_v24 = vld [vmem:[#allocation4 + $0x60] sm:$0xff]   ;;  %v320_v42 = vsub.s32 0, %v319_v35 }
  0x3a   :  { %v345_v15 = vld [vmem:[#allocation6] ss:$0 sm:$0xff]  ;;  %v443_v25 = vld [vmem:[#allocation4 + $0x68] sm:$0xff]   ;;  %v349_v26 = vld [vmem:[#allocation6 + $0x1] ss:$0 sm:$0xff] }
  0x3b   :  { %v358_v36 = vld [vmem:[#allocation6 + $0x2] ss:$0 sm:$0xff]  ;;  %v315_v37 = vld [vmem:[#allocation4 + $0x70] sm:$0x1]  ;;  %v364_v51 = vld [vmem:[#allocation6 + $0x3] ss:$0 sm:$0xff] }
  0x3c   :  { %385 = vmatpush3.bf16.msra.mxu0 %v431_v2  ;;  %393 = vmatpush3.bf16.msra.mxu1 %v433_v6  ;;  %v316_v41 = vunpack.c.l.bf16 %v315_v37 }
  0x3d   :  { %410 = vmatprep.subr.bf16.mxu0 %v523_v0  ;;  %394 = vmatprep.subr.bf16.mxu1 %v523_v0 }
  0x3e   :  { %v321_v47 = vrot.slane %v316_v41, %v320_v42 }
  0x3f   :  { %387 = vmatmul.mubr.msk.bf16.vlgmr.msra.gmra.mrb[0].mxu0 %vm75_vm1, %v53_v5 }
  0x40   :  { %418 = vmatprep.mubr.msk.bf16.mxu0 %vm524_vm0, %v523_v0  ;;  %395 = vmatpush3.bf16.msra.mxu1 %v434_v7 }
  0x41   :  { %396 = vmatprep.subr.bf16.mxu1 %v523_v0  ;;  %411 = vmatpush3.bf16.msra.mxu0 %v440_v13 }
  0x42   :  { %412 = vmatprep.subr.bf16.mxu0 %v523_v0 }
  0x44   :  { %397 = vmatpush3.bf16.msra.mxu1 %v435_v8 }
  0x45   :  { %398 = vmatprep.subr.bf16.mxu1 %v523_v0  ;;  %413 = vmatpush3.bf16.msra.mxu0 %v441_v14 }
  0x46   :  { %414 = vmatprep.subr.bf16.mxu0 %v523_v0 }
  0x48   :  { %399 = vmatpush3.bf16.msra.mxu1 %v436_v9 }
  0x49   :  { %400 = vmatprep.subr.bf16.mxu1 %v523_v0  ;;  %415 = vmatpush3.bf16.msra.mxu0 %v442_v24 }
  0x4a   :  { %416 = vmatprep.subr.bf16.mxu0 %v523_v0 }
  0x4c   :  { %401 = vmatpush3.bf16.msra.mxu1 %v437_v10 }
  0x4d   :  { %402 = vmatprep.subr.bf16.mxu1 %v523_v0  ;;  %417 = vmatpush3.bf16.msra.mxu0 %v443_v25 }
  0x50   :  { %403 = vmatpush3.bf16.msra.mxu1 %v438_v11 }
  0x51   :  { %404 = vmatprep.subr.bf16.mxu1 %v523_v0 }
  0x54   :  { %405 = vmatpush3.bf16.msra.mxu1 %v439_v12 }
 0x112   :  { %v113_v16 = vpop.f32.mrb[0].mxu0 }
 0x113   :  { %v114_v17 = vadd.f32 %v345_v15, %v113_v16  ;;  %v388_v18 = vpop.f32.mrb[1].mxu0 }
 0x114   :  { %v116_v19 = vpop.f32.mrb[2].mxu0 }
 0x115   :  { %v119_v20 = vpack.c.bf16 %v114_v17, %v114_v17  ;;  %v389_v21 = vpop.f32.mrb[3].mxu0 }
 0x117   :  { %v120_v23 = vmax.bf16 %v525_v22, %v119_v20 }
 0x119   :  { %407 = vmatmul.mubr.bf16.vlgmr.msra.gmra.mrb[0].mxu1 %v120_v23 }
 0x1ec   :  { %v224_v27 = vpop.f32.mrb[0].mxu1 }
 0x1ed   :  { %v225_v28 = vadd.f32 %v349_v26, %v224_v27  ;;  %v408_v29 = vpop.f32.mrb[1].mxu1 }
 0x1ee   :  { %v227_v30 = vpop.f32.mrb[2].mxu1 }
 0x1ef   :  { %v230_v31 = vpack.c.bf16 %v225_v28, %v225_v28  ;;  %v409_v32 = vpop.f32.mrb[3].mxu1 }
 0x1f1   :  { %v231_v33 = vmax.bf16 %v525_v22, %v230_v31 }
 0x1f3   :  { %419 = vmatmul.mubr.msk.bf16.vlgmr.msra.gmra.mrb[4].mxu0 %vm269_vm2, %v231_v33 }
 0x2c6   :  { %v307_v38 = vpop.f32.mrb[4].mxu0 }
 0x2c7   :  { %v308_v39 = vadd.f32 %v358_v36, %v307_v38  ;;  %v420_v40 = vpop.f32.mrb[5].mxu0 }
 0x2c8   :  { %v310_v43 = vpop.f32.mrb[6].mxu0 }
 0x2c9   :  { %v313_v44 = vpack.c.bf16 %v308_v39, %v308_v39  ;;  %v421_v45 = vpop.f32.mrb[7].mxu0 }
 0x2cb   :  { %v314_v46 = vmax.bf16 %v525_v22, %v313_v44 }
 0x2cd   :  { %v317_v48 = vunpack.c.l.bf16 %v314_v46 }
 0x2cf   :  { %v322_v49 = vmul.f32 %v321_v47, %v317_v48 }
 0x2d1   :  { %v323_v50 = vsel %vm75_vm1, %v322_v49, 0.0 }
 0x2d2   :  { %324 = vadd.xlane.f32.xlu0 %v323_v50 }
 0x35f   :  { %v325_v52 = vpop.xlane.xlu0 %324 }
 0x360   :  { %v331_v53 = vadd.f32 %v364_v51, %v325_v52 }
 0x362   :  { %v332_v54 = vsub.f32 0.0, %v331_v53 }
 0x364   :  { %v333_v55 = vmul.f32 1.442695, %v332_v54 }
 0x366   :  { %444 = vpow2.f32 %v333_v55 }
 0x370   :  { %v445_v56 = vpop.eup %444 }
 0x371   :  { %v335_v57 = vadd.f32 1.0, %v445_v56 }
 0x373   :  { %446 = vrcp.f32 %v335_v57 }
 0x37d   :  { %v447_v58 = vpop.eup %446 }
 0x37e   :  { %338 = vst.msk [vmem:[%s593_s3] sm:$0xff] %vm337_vm3, %v447_v58 }
 0x37f   :  { %343 = vsyncpa [#allocation3], 1 }
 0x380   :  { %344 = vsyncpa [#allocation5], 1 }

</bundles_post_ra>
